<compile_context>
chip_gen: v7x
topology: tpu7x:2x2x1
jax: 0.10.0
libtpu: 0.0.40
codegen_flags: <defaults>
</compile_context>

<pallas_src>
import jax
import jax.numpy as jnp
from jax.experimental import pallas as pl
from jax.experimental.pallas import tpu as pltpu


def _cdiv(a: int, b: int) -> int:
    return -(-a // b)


def _round_up(v: int, m: int) -> int:
    return _cdiv(v, m) * m


def _round_down(v: int, m: int) -> int:
    return (v // m) * m


def _chomp_copy_kernel(x_ref, o_ref):
    # Pure streaming copy.  Input and output blocks cover the same (row, lane)
    # offsets; lanes past the kept width exist only as masked padding on the
    # final lane block, so chomped data is (almost) never read and never
    # written.
    o_ref[...] = x_ref[...]


def chomp2d(
    x: jax.Array,
    chomp_size: int,
    *,
    min_pallas_bytes: int = 1 << 20,   # below this, plain XLA slice wins
    target_bytes: int = 8 << 20,       # per-buffer tile target (sweep 4-8 MiB)
) -> jax.Array:
    """Pallas implementation of Chomp2d.forward for NCHW input."""
    assert x.ndim == 4, "expected NCHW input"
    n, c, h, w = x.shape
    h_out = h - chomp_size
    assert 0 < h_out <= h, "chomp_size must satisfy 0 <= chomp_size < H"

    if chomp_size == 0:
        return x  # nothing to drop; already contiguous in JAX

    nc = n * c
    hw = h * w
    ow = h_out * w  # kept elements per plane -> output lane axis
    itemsize = jnp.dtype(x.dtype).itemsize

    # Small-tensor fast path: launch + fixed per-step overhead dwarfs the copy.
    if nc * hw * itemsize < min_pallas_bytes:
        return x[:, :, :h_out, :]

    # Collapse N, C and flatten each plane into the lane axis (free reshape of
    # a contiguous NCHW tensor).
    x2 = x.reshape(nc, hw)

    # ---- tile sizing --------------------------------------------------------
    sublane = max(8, 32 // itemsize)        # 8 for f32, 16 for bf16, 32 for i8
    ow128 = _round_up(ow, 128)

    # Lane tile: as wide as the kept plane-row (rounded up to 128 lanes), but
    # capped so even a minimum-height block stays within the per-buffer budget
    # (this is the 2-D tiling that keeps huge planes out of VMEM trouble).
    max_tl = max(128, _round_down(target_bytes // (sublane * itemsize), 128))
    tl = min(ow128, max_tl)

    # Row tile: fill the remaining budget with whole sublane groups.
    tb = max(1, target_bytes // (tl * itemsize))
    if tb >= nc:
        tb = nc                              # full first dim -> always legal
    else:
        tb = max(sublane, _round_down(tb, sublane))

    # Keep enough grid steps for (a) read/write DMA overlap and (b) megacore
    # sharding on chips with 2 TensorCores.  Aim for >=4 on large inputs.
    min_steps = 4 if nc * ow * itemsize >= (4 << 20) else 2

    def _steps(tb_, tl_):
        return _cdiv(nc, tb_) * _cdiv(ow, tl_)

    while _steps(tb, tl) < min_steps and tb > sublane:
        tb = max(sublane, _round_down(tb // 2, sublane))
    while _steps(tb, tl) < min_steps and tl > 128:
        tl = max(128, _round_down(tl // 2, 128))

    grid = (_cdiv(nc, tb), _cdiv(ow, tl))

    # VMEM budget: in + out blocks, each double-buffered, plus headroom for
    # Mosaic-internal scratch.  Capped well below v7x's 64 MiB physical VMEM.
    block_bytes = tb * tl * itemsize
    vmem_limit = min(48 << 20, 4 * block_bytes + (8 << 20))

    out2 = pl.pallas_call(
        _chomp_copy_kernel,
        out_shape=jax.ShapeDtypeStruct((nc, ow), x.dtype),
        grid_spec=pltpu.PrefetchScalarGridSpec(
            num_scalar_prefetch=0,
            grid=grid,
            in_specs=[pl.BlockSpec((tb, tl), lambda i, j: (i, j))],
            out_specs=pl.BlockSpec((tb, tl), lambda i, j: (i, j)),
        ),
        compiler_params=pltpu.CompilerParams(
            # Both axes are independent copies; "parallel" lets v7x shard the
            # grid across its two TensorCores, harmless on v5e/v6e.
            dimension_semantics=("parallel", "parallel"),
            vmem_limit_bytes=vmem_limit,
        ),
    )(x2)

    return out2.reshape(n, c, h_out, w)


if __name__ == "__main__":
    # Chomp2d has no learnable parameters; only chomp_size.
    chomp_size = 3

    key = jax.random.PRNGKey(0)
    # NCHW input, small shapes: batch=2, channels=4, H=16, W=16.
    x = jax.random.normal(key, (2, 4, 16, 16), dtype=jnp.float32)
    y_ref = x[:, :, : x.shape[2] - chomp_size, :]

    # Force the Pallas path (a tensor this small would normally take the
    # small-tensor XLA fast path).
    y = jax.block_until_ready(chomp2d(x, chomp_size, min_pallas_bytes=0))
    assert y.shape == y_ref.shape and y.dtype == y_ref.dtype
    assert bool(jnp.all(y == y_ref))

    # Small-tensor fast path (default threshold) must also match.
    y_fast = jax.block_until_ready(chomp2d(x, chomp_size))
    assert bool(jnp.all(y_fast == y_ref))

    # Exercise the 2-D (row x lane) tiling with an unaligned kept-row width, a
    # packed dtype, and a deliberately tiny per-buffer budget.
    x2 = jax.random.normal(jax.random.PRNGKey(1), (2, 3, 40, 24), dtype=jnp.bfloat16)
    y2 = jax.block_until_ready(
        chomp2d(x2, 5, min_pallas_bytes=0, target_bytes=64 * 1024))
    y2_ref = x2[:, :, : x2.shape[2] - 5, :]
    assert y2.shape == y2_ref.shape and y2.dtype == y2_ref.dtype
    assert bool(jnp.all(y2 == y2_ref))

    print("KERNEL_OK")
</pallas_src>

<mosaic_0001>
module attributes {stable_mosaic.version = 11 : i64} {
  func.func @_chomp_copy_kernel(%arg0: i32, %arg1: i32, %arg2: memref<8x128xf32, #tpu.memory_space<vmem>>, %arg3: memref<8x128xf32, #tpu.memory_space<vmem>>) attributes {dimension_semantics = [#tpu.dimension_semantics<parallel>, #tpu.dimension_semantics<parallel>], iteration_bounds = array<i64: 1, 2>, scalar_prefetch = 0 : i64, scratch_operands = 0 : i64, tpu.core_type = #tpu.core_type<tc>, window_params = [{transform_indices = @transform_0, window_bounds = array<i64: 8, 128>}, {transform_indices = @transform_1, window_bounds = array<i64: 8, 128>}]} {
    %c0 = arith.constant 0 : index
    %c0_0 = arith.constant 0 : index
    %0 = vector.load %arg2[%c0, %c0_0] : memref<8x128xf32, #tpu.memory_space<vmem>>, vector<8x128xf32>
    %c0_1 = arith.constant 0 : index
    %c0_2 = arith.constant 0 : index
    %1 = vector.load %arg3[%c0_1, %c0_2] : memref<8x128xf32, #tpu.memory_space<vmem>>, vector<8x128xf32>
    tpu.vector_store %arg3[%c0_1, %c0_2], %0 {strides = array<i32>} : memref<8x128xf32, #tpu.memory_space<vmem>>, vector<8x128xf32>,
    return
  }
  func.func @transform_0(%arg0: i32, %arg1: i32) -> (i32, i32) {
    %c0_i32 = arith.constant 0 : i32
    return %arg0, %arg1 : i32, i32
  }
  func.func @transform_1(%arg0: i32, %arg1: i32) -> (i32, i32) {
    %c0_i32 = arith.constant 0 : i32
    return %arg0, %arg1 : i32, i32
  }
}

</mosaic_0001>

<bundles_post_ra>
// kernel: tpu_custom_call.1
= control target key start
LH: loop header
LB: loop body
LE: loop exit
PB: predicated region body
PF: predicated region fallthrough
CT: control target
= control target key end

     0   :  { %6 = vsyncpa [#allocation3], 0  ;;  %s623_s0 = inlined_call_operand.hbm [shape: f32[8,256], index: 0, kind: input, shape index: {}]   ;;  %s624_s1 = inlined_call_operand.hbm [shape: f32[8,208], index: 1, kind: output, shape index: {}]  }
   0x1   :  { %8 = vsyncpa [#allocation3 + $0x1], 0 }
   0x2   :  { %9 = vsyncpa [#allocation4], 0 }
   0x3   :  { %11 = vsyncpa [#allocation4 + $0x1], 0  ;;  %s451_s6 = smov 0   ;;  %s453_s7 = smov 0  }
   0x4   :  { %s455_s8 = smov 0   ;;  %s457_s9 = smov 0  }
   0x5   :  { %s459_s10 = smov 0   ;;  %s461_s11 = smov 0  }
   0x6 LB: > { %s250_s12 = sadd.s32 4294967295, %s437_s11   ;;  %s251_s13 = sadd.s32 4294967294, %s437_s11   ;;  %s437_s11 = sphi %s461_s11, %s17_s11   ;;  %s433_s10 = sphi %s459_s10, %s640_s10   ;;  %s429_s9 = sphi %s457_s9, %s639_s9   ;;  %s425_s8 = sphi %s455_s8, %s638_s8   ;;  %s421_s7 = sphi %s453_s7, %s637_s7   ;;  %s417_s6 = sphi %s451_s6, %s636_s6  }
   0x7   : > { %s26_s14 = sadd.s32 1, %s433_s10  ;;  %s38_s15 = sadd.s32 1, %s425_s8 }
   0x8   : > { %p27_p0 = scmp.ge.s32.totalorder %s26_s14, 2  ;;  %p45_p1 = scmp.ne.s32.totalorder %s425_s8, %s421_s7 }
   0x9   : > { %p46_p2 = scmp.eq.s32.totalorder %s437_s11, 0  ;;  %p51_p3 = scmp.ne.s32.totalorder %s421_s7, %s417_s6 }
   0xa   : > { %s642_s14 = smov (%p27_p0, %s26_s14), 0  ;;  %p52_p5 = scmp.eq.s32.totalorder %s250_s12, 0 }
   0xb   : > { %p492_p4 = por %p46_p2, %p45_p1  ;;  %s34_s17 = ssub.s32 %s433_s10, %s642_s14 }
   0xc   : > { %p77_p6 = scmp.eq.s32.totalorder %s250_s12, 1  ;;  %p36_p7 = scmp.eq.s32.totalorder %s34_s17, 0 }
   0xd   : > { %p498_p8 = por %p52_p5, %p51_p3  ;;  %p83_p10 = scmp.eq.s32.totalorder %s251_s13, 1 }
   0xe   : > { %p502_p9 = por %p77_p6, %p45_p1  ;;  %p275_p13 = scmp.lt.s32.totalorder %s437_s11, 2 }
   0xf   : > { %s507_s20 = scalar_select %p36_p7, %s425_s8, %s38_s15  }
  0x10   : > { %s628_s19 = scalar_select %p502_p9, 1, 0 }
  0x11   : > { %p509_p11 = por %p83_p10, %p51_p3  ;;  %s103_s22 = sand.u32 1, %s425_s8  }
  0x12   : > { %s254_s23 = sshll.u32 %s103_s22, 3  ;;  %s255_s24 = sshll.u32 %s433_s10, 7 }
  0x13   : > { %s629_s21 = scalar_select %p509_p11, 1, 0 }
  0x14   : > { %s520_s27 = scalar_lea.hbm %s623_s0, %s255_s24  ;;  %s107_s28 = scalar_lea.vmem [#allocation2], %s254_s23 }
  0x15   : > { %s116_s29 = sshll.u32 %s107_s28, 4  ;;  %p526_p0 = pnand %p275_p13, %p492_p4  ;;  %s522_s29 = int_to_ptr.vmem [resolvable:$true] %s116_s29 }
  0x16   : > { %s104_s2 = scalar_lea.sflag [#allocation3], %s103_s22  ;;  %s325_s3 = scalar_lea.hbm %s520_s27, 128 }
  0x17   : > { %p326_p3 = scmp.ne.s32.totalorder %s520_s27, %s325_s3  ;;  %p327_p5 = pneg %p526_p0 }
  0x18   : > { %s330_s12 = scalar_lea.hbm %s623_s0, 256  ;;  %p331_p4 = scmp.lt.u32.totalorder %s520_s27, %s623_s0 }
  0x19   : > { %p328_p6 = pnand %p327_p5, %p326_p3  ;;  %p332_p10 = scmp.lt.u32.totalorder %s330_s12, %s325_s3 }
  0x1a   : > { %p334_p12 = scmp.lt.u32.totalorder %s325_s3, %s520_s27 }
  0x1b   : > { %p329_p7 = pneg %p328_p6  ;;  %p333_p13 = por %p332_p10, %p331_p4 }
  0x1d   : > { %p335_p1 = por %p334_p12, %p333_p13 }
  0x1f   : > { %p336_p2 = pnand %p335_p1, %p329_p7 }
  0x21   : > { %339 = shalt.err (!%p336_p2)
}
  0x22   : > { %s340_s16 = scalar_lea.vmem %s522_s29, 128  ;;  %s439_s17 = smov [#allocation2]  }
  0x23   : > { %p341_p3 = scmp.ne.s32.totalorder %s522_s29, %s340_s16  ;;  %s345_s22 = sshll.u32 %s439_s17, 4  ;;  %s346_s22 = int_to_ptr.vmem [resolvable:$false] %s345_s22 }
  0x24   : > { %s347_s23 = scalar_lea.vmem %s346_s22, 256  ;;  %p348_p9 = scmp.lt.s32.totalorder %s522_s29, %s346_s22 }
  0x25   : > { %p343_p6 = pnand %p341_p3, %p327_p5  ;;  %p349_p4 = scmp.lt.s32.totalorder %s347_s23, %s340_s16 }
  0x27   : > { %p344_p11 = pneg %p343_p6  ;;  %p350_p10 = por %p349_p4, %p348_p9 }
  0x29   : > { %p351_p12 = pnand %p350_p10, %p344_p11 }
  0x2b   : > { %354 = shalt.err (!%p351_p12)
}
  0x2c   : > { %270 = dma.hbm_to_vmem [thread:$0]  (!%p526_p0), %s520_s27, 128, %s522_s29, %s104_s2  }
  0x2d   : > { %p631_p1 = scmp.lt.s32.totalorder %s437_s11, 3  ;;  %p632_p2 = scmp.ge.s32.totalorder %s437_s11, 1 }
  0x2f   : > { %p122_p5 = pnand %p632_p2, %p631_p1 }
  0x30   : > { %s562_s24 = sand.u32 (!%p122_p5), 1, %s421_s7  }
  0x31   : > { %125 = sbr.rel (%p122_p5) target bundleno = 83 (0x53), region = 24  ;;  %s257_s25 = sshll.u32 (!%p122_p5), %s562_s24, 3 }
  0x32   : > { %s128_s26 = scalar_lea.sflag (!%p122_p5), [#allocation3], %s562_s24  ;;  %s131_s28 = scalar_lea.vmem (!%p122_p5), [#allocation2], %s257_s25 }
  0x38   : > { %408 = dma.done.wait (%p498_p8), %s128_s26, 128  }
  0x39   : > { %410 = vsyncadd (%p498_p8), %s128_s26, 4294967168  ;;  %s149_s27 = scalar_lea.vmem [#allocation5], %s257_s25  ;;  %s260_s30 = sshll.u32 %s429_s9, 7  ;;  %v150_v0 = vld [vmem:[%s131_s28] sm:$0xff] }
  0x3a   : > { %s168_s29 = sshll.u32 %s149_s27, 4  ;;  %s576_s4 = scalar_lea.hbm %s624_s1, %s260_s30  ;;  %151 = vst [vmem:[%s149_s27] sm:$0xff] %v150_v0  ;;  %s571_s29 = int_to_ptr.vmem [resolvable:$true] %s168_s29 }
  0x3b   : > { %s153_s18 = scalar_lea.sflag [#allocation4], %s562_s24  ;;  %s355_s5 = scalar_lea.vmem %s571_s29, 128 }
  0x3c   : > { %p356_p8 = scmp.ne.s32.totalorder %s571_s29, %s355_s5  ;;  %p633_p9 = scmp.ne.s32.totalorder %s628_s19, 0 }
  0x3d   : > { %s440_s12 = smov [#allocation5]  }
  0x3e   : > { %p357_p11 = pnand %p356_p8, %p633_p9  ;;  %s359_s9 = sshll.u32 %s440_s12, 4  ;;  %s360_s9 = int_to_ptr.vmem [resolvable:$false] %s359_s9 }
  0x3f   : > { %s361_s13 = scalar_lea.vmem %s360_s9, 256  ;;  %p362_p7 = scmp.lt.s32.totalorder %s571_s29, %s360_s9 }
  0x40   : > { %p358_p0 = pneg %p357_p11  ;;  %p363_p13 = scmp.lt.s32.totalorder %s361_s13, %s355_s5 }
  0x42   : > { %p364_p3 = por %p363_p13, %p362_p7 }
  0x44   : > { %p365_p6 = pnand %p364_p3, %p358_p0 }
  0x46   : > { %368 = shalt.err (!%p365_p6)
}
  0x47   : > { %s369_s15 = scalar_lea.hbm %s576_s4, 128  ;;  %s373_s22 = scalar_lea.hbm %s624_s1, 256 }
  0x48   : > { %p370_p4 = scmp.ne.s32.totalorder %s576_s4, %s369_s15  ;;  %p374_p1 = scmp.lt.u32.totalorder %s576_s4, %s624_s1 }
  0x49   : > { %p375_p2 = scmp.lt.u32.totalorder %s373_s22, %s369_s15  ;;  %p377_p8 = scmp.lt.u32.totalorder %s369_s15, %s576_s4 }
  0x4a   : > { %p371_p10 = pnand %p370_p4, %p633_p9 }
  0x4b   : > { %p376_p5 = por %p375_p2, %p374_p1 }
  0x4c   : > { %p372_p12 = pneg %p371_p10 }
  0x4d   : > { %p378_p11 = por %p377_p8, %p376_p5 }
  0x4f   : > { %p379_p0 = pnand %p378_p11, %p372_p12 }
  0x51   : > { %382 = shalt.err (!%p379_p0)
}
  0x52   : > { %265 = dma.vmem_to_hbm [thread:$0]  (%p633_p9), %s571_s29, 128, %s576_s4, %s153_s18  }
  0x53 PF: > { %s180_s25 = sand.u32 1, %s417_s6   ;;  %p634_p7 = scmp.ne.s32.totalorder %s629_s21, 0 }
  0x54   : > { %p635_p13 = scmp.ge.s32.totalorder %s437_s11, 2  ;;  %s181_s26 = scalar_lea.sflag [#allocation4], %s180_s25 }
  0x56   : > { %p272_p3 = pnand %p635_p13, %p634_p7 }
  0x58   : > { %412 = dma.done.wait (!%p272_p3), %s181_s26, 128  }
  0x59   : > { %414 = vsyncadd (!%p272_p3), %s181_s26, 4294967168  ;;  %s17_s11 = sadd.s32 1, %s437_s11   ;;  %s636_s6 = smov %s421_s7 }
  0x5a   : > { %p14_p6 = scmp.ge.s32.totalorder %s17_s11, 4   ;;  %s637_s7 = smov %s425_s8 }
  0x5b   : > { %s638_s8 = smov %s507_s20  ;;  %s639_s9 = smov %s433_s10 }
  0x5c   : > { %s640_s10 = smov %s642_s14  ;;  %16 = sbr.rel (!%p14_p6) target bundleno = 6 (0x6), region = 69 }
  0x63   :  { %186 = vsyncpa [#allocation3], 1 }
  0x64   :  { %188 = vsyncpa [#allocation3 + $0x1], 1 }
  0x65   :  { %189 = vsyncpa [#allocation4], 1 }
  0x66   :  { %191 = vsyncpa [#allocation4 + $0x1], 1 }

</bundles_post_ra>
